<compile_context>
chip_gen: v7x
topology: tpu7x:2x2x1
jax: 0.10.0
libtpu: 0.0.40
codegen_flags: <defaults>
</compile_context>

<pallas_src>
import functools

import jax
import jax.numpy as jnp
from jax import lax
from jax.experimental import pallas as pl
from jax.experimental.pallas import tpu as pltpu

EPS = 1e-5


# --------------------------------------------------------------------------
# kernel
# --------------------------------------------------------------------------
def resblock_kernel(x_ref, w1_ref, g1_ref, b1_ref, w2_ref, g2_ref, b2_ref,
                    p_ref, sp_ref, sn_ref, o_ref, *, inv_count,
                    use_full_pre_activation):
    # x_ref:  (N*H, W*C) f32, lane-dense (lane = w*C + c, row = n*H + h)
    # w*_ref: (3, W*C, W*C) bf16 banded conv weights, one matrix per kernel row
    # g*,b*:  (1, W*C) f32 per-channel gamma/beta tiled over W
    # p_ref:  (W*C, W*C) f32 channel-match matrix (folds + re-expands channels)
    # sp/sn:  (N*H, N*H) f32 row-shift matrices (h-1 / h+1, zero at image edges)
    x = x_ref[...]
    p = p_ref[...]
    sp = sp_ref[...]
    sn = sn_ref[...]

    def conv3x3(y, w_ref):
        """3x3 same-conv (stride 1, pad 1, no bias) via 3 band matmuls."""
        yb = y.astype(jnp.bfloat16)
        # rows at h-1 / h+1 (zeroed at image boundaries by the shift matrices)
        y_up = jnp.dot(sp, y, preferred_element_type=jnp.float32).astype(jnp.bfloat16)
        y_dn = jnp.dot(sn, y, preferred_element_type=jnp.float32).astype(jnp.bfloat16)
        acc = jnp.dot(y_up, w_ref[0], preferred_element_type=jnp.float32)
        acc = acc + jnp.dot(yb, w_ref[1], preferred_element_type=jnp.float32)
        acc = acc + jnp.dot(y_dn, w_ref[2], preferred_element_type=jnp.float32)
        return acc

    def batchnorm(y, g_ref, b_ref):
        """Training-mode BN, single pass over y (sum + sum-of-squares)."""
        s = jnp.sum(y, axis=0, keepdims=True)            # (1, W*C)
        sq = jnp.sum(y * y, axis=0, keepdims=True)       # (1, W*C)
        # fold over W per channel and re-expand to the lane layout in one matmul
        mean = jnp.dot(s, p, preferred_element_type=jnp.float32) * inv_count
        ex2 = jnp.dot(sq, p, preferred_element_type=jnp.float32) * inv_count
        var = jnp.maximum(ex2 - mean * mean, 0.0)        # biased variance
        scale = lax.rsqrt(var + EPS) * g_ref[...]
        shift = b_ref[...] - mean * scale
        return y * scale + shift                         # lane-dense affine

    relu = lambda t: jnp.maximum(t, 0.0)

    if use_full_pre_activation:
        out = conv3x3(relu(batchnorm(x, g1_ref, b1_ref)), w1_ref)
        out = conv3x3(relu(batchnorm(out, g2_ref, b2_ref)), w2_ref)
        out = out + x
    else:
        out = relu(batchnorm(conv3x3(x, w1_ref), g1_ref, b1_ref))
        out = batchnorm(conv3x3(out, w2_ref), g2_ref, b2_ref)
        out = relu(out + x)

    o_ref[...] = out.astype(o_ref.dtype)


# --------------------------------------------------------------------------
# wrapper (all layout plumbing / constant building happens here, in XLA)
# --------------------------------------------------------------------------
def _band_weights(w_oihw, W):
    """OIHW (Cout,Cin,3,3) -> (3, W*Cin, W*Cout) bf16 banded matrices.

    B[dh, w'*Cin+ci, w*Cout+co] = W_hwio[dh, w'-w+1, ci, co] for w'-w+1 in
    {0,1,2}, else 0 -- i.e. the W taps and W zero-padding of a stride-1,
    pad-1 cross-correlation folded into one matmul per kernel row dh.
    """
    c_out, c_in, _, _ = w_oihw.shape
    w_hwio = jnp.transpose(w_oihw, (2, 3, 1, 0))          # (3,3,Cin,Cout)
    wp = jnp.arange(W)[:, None]                           # input position w'
    wo = jnp.arange(W)[None, :]                           # output position w
    dw = wp - wo + 1                                      # (W, W)
    valid = (dw >= 0) & (dw <= 2)
    dwc = jnp.clip(dw, 0, 2)
    band = w_hwio[:, dwc, :, :]                           # (3, W, W, Cin, Cout)
    band = jnp.where(valid[None, :, :, None, None], band, 0.0)
    band = jnp.transpose(band, (0, 1, 3, 2, 4))           # (3, W, Cin, W, Cout)
    return band.reshape(3, W * c_in, W * c_out).astype(jnp.bfloat16)


def resblock_forward(x_nchw, w1, g1, b1, w2, g2, b2, use_full_pre_activation):
    """x_nchw: (N,C,H,W) f32; w*: (Cout,Cin,3,3) PyTorch OIHW; g*,b*: (C,)."""
    N, C, H, W = x_nchw.shape
    NH, WC = N * H, W * C

    # NCHW -> NHWC -> lane-dense (N*H, W*C)
    x2 = jnp.transpose(x_nchw, (0, 2, 3, 1)).reshape(NH, WC)

    bw1 = _band_weights(w1, W)
    bw2 = _band_weights(w2, W)

    # per-channel affine params tiled to the lane layout (lane = w*C + c)
    g1_wc = jnp.tile(g1, W).reshape(1, WC).astype(jnp.float32)
    b1_wc = jnp.tile(b1, W).reshape(1, WC).astype(jnp.float32)
    g2_wc = jnp.tile(g2, W).reshape(1, WC).astype(jnp.float32)
    b2_wc = jnp.tile(b2, W).reshape(1, WC).astype(jnp.float32)

    # channel-match matrix: P[w'*C+ci, w*C+c] = 1 iff ci == c
    lane = jnp.arange(WC)
    p_mat = (lane[:, None] % C == lane[None, :] % C).astype(jnp.float32)

    # row-shift matrices: pick row h-1 / h+1 of the same image, zero at borders
    r = jnp.arange(NH)
    h_of = r % H
    s_prev = ((r[None, :] == r[:, None] - 1) &
              (h_of[:, None] != 0)).astype(jnp.float32)
    s_next = ((r[None, :] == r[:, None] + 1) &
              (h_of[:, None] != H - 1)).astype(jnp.float32)

    kernel = functools.partial(
        resblock_kernel,
        inv_count=1.0 / float(N * H * W),
        use_full_pre_activation=use_full_pre_activation)

    def full(shape):
        return pl.BlockSpec(shape, lambda *_, s=shape: (0,) * len(s))

    # advisory cost estimate (2 convs: 3 band matmuls + 2 shift matmuls each)
    flops = (2 * (3 * 2 * NH * WC * WC + 2 * 2 * NH * NH * WC)
             + 2 * 2 * 2 * WC * WC          # BN stat folds
             + 16 * NH * WC)                # elementwise
    bytes_accessed = (4 * 2 * NH * WC       # x in + out (f32)
                      + 2 * 2 * 3 * WC * WC # two bf16 band-weight tensors
                      + 4 * WC * WC         # channel-match matrix
                      + 2 * 4 * NH * NH     # shift matrices
                      + 4 * 4 * WC)         # gammas / betas

    out2 = pl.pallas_call(
        kernel,
        grid=(1,),
        in_specs=[full((NH, WC)),
                  full((3, WC, WC)), full((1, WC)), full((1, WC)),
                  full((3, WC, WC)), full((1, WC)), full((1, WC)),
                  full((WC, WC)), full((NH, NH)), full((NH, NH))],
        out_specs=full((NH, WC)),
        out_shape=jax.ShapeDtypeStruct((NH, WC), jnp.float32),
        compiler_params=pltpu.CompilerParams(
            dimension_semantics=("arbitrary",),
            vmem_limit_bytes=32 * 1024 * 1024),
        cost_estimate=pl.CostEstimate(flops=int(flops), transcendentals=2 * WC,
                                      bytes_accessed=int(bytes_accessed)),
    )(x2, bw1, g1_wc, b1_wc, bw2, g2_wc, b2_wc, p_mat, s_prev, s_next)

    return jnp.transpose(out2.reshape(N, H, W, C), (0, 3, 1, 2))   # back to NCHW


# ---------------- pure-JAX reference (correctness check only) ----------------
def resblock_ref(x, w1, g1, b1, w2, g2, b2, use_full_pre_activation):
    def conv(t, w):
        return lax.conv_general_dilated(
            t, w, (1, 1), ((1, 1), (1, 1)),
            dimension_numbers=("NCHW", "OIHW", "NCHW"))

    def bn(t, g, b):
        mean = jnp.mean(t, axis=(0, 2, 3), keepdims=True)
        var = jnp.mean((t - mean) ** 2, axis=(0, 2, 3), keepdims=True)
        return (t - mean) * lax.rsqrt(var + EPS) * g.reshape(1, -1, 1, 1) \
            + b.reshape(1, -1, 1, 1)

    relu = lambda t: jnp.maximum(t, 0.0)
    identity = x
    if use_full_pre_activation:
        o = conv(relu(bn(x, g1, b1)), w1)
        o = conv(relu(bn(o, g2, b2)), w2)
        return o + identity
    else:
        o = relu(bn(conv(x, w1), g1, b1))
        o = bn(conv(o, w2), g2, b2)
        return relu(o + identity)


if __name__ == "__main__":
    key = jax.random.PRNGKey(0)
    N, C, H, W = 2, 8, 16, 16            # planes = 8, stride = 1  ->  W*C = 128
    ks = jax.random.split(key, 5)
    x = jax.random.normal(ks[0], (N, C, H, W), jnp.float32)
    w1 = 0.1 * jax.random.normal(ks[1], (C, C, 3, 3), jnp.float32)
    w2 = 0.1 * jax.random.normal(ks[2], (C, C, 3, 3), jnp.float32)
    g1 = 1.0 + 0.1 * jax.random.normal(ks[3], (C,), jnp.float32)
    b1 = 0.1 * jax.random.normal(ks[4], (C,), jnp.float32)
    g2 = jnp.ones((C,), jnp.float32)
    b2 = jnp.zeros((C,), jnp.float32)

    ok = True
    for flag in (False, True):
        out = jax.block_until_ready(
            resblock_forward(x, w1, g1, b1, w2, g2, b2, flag))
        ref = resblock_ref(x, w1, g1, b1, w2, g2, b2, flag)
        # bf16 matmul operands (f32 accumulation) -> relaxed tolerance
        ok = ok and bool(jnp.allclose(out, ref, rtol=2e-2, atol=2e-2))

    if ok:
        print("KERNEL_OK")
    else:
        raise SystemExit("mismatch vs reference")
</pallas_src>

<mosaic_0001>
module attributes {stable_mosaic.version = 11 : i64} {
  func.func @resblock_kernel(%arg0: i32, %arg1: memref<32x128xf32, #tpu.memory_space<vmem>>, %arg2: memref<3x128x128xbf16, #tpu.memory_space<vmem>>, %arg3: memref<1x128xf32, #tpu.memory_space<vmem>>, %arg4: memref<1x128xf32, #tpu.memory_space<vmem>>, %arg5: memref<3x128x128xbf16, #tpu.memory_space<vmem>>, %arg6: memref<1x128xf32, #tpu.memory_space<vmem>>, %arg7: memref<1x128xf32, #tpu.memory_space<vmem>>, %arg8: memref<128x128xf32, #tpu.memory_space<vmem>>, %arg9: memref<32x32xf32, #tpu.memory_space<vmem>>, %arg10: memref<32x32xf32, #tpu.memory_space<vmem>>, %arg11: memref<32x128xf32, #tpu.memory_space<vmem>>) attributes {dimension_semantics = [#tpu.dimension_semantics<arbitrary>], iteration_bounds = array<i64: 1>, scalar_prefetch = 0 : i64, scratch_operands = 0 : i64, tpu.core_type = #tpu.core_type<tc>, window_params = [{pipeline_mode = #tpu.pipeline_mode<synchronous>, transform_indices = @transform_0, window_bounds = array<i64: 32, 128>}, {pipeline_mode = #tpu.pipeline_mode<synchronous>, transform_indices = @transform_1, window_bounds = array<i64: 3, 128, 128>}, {pipeline_mode = #tpu.pipeline_mode<synchronous>, transform_indices = @transform_2, window_bounds = array<i64: 1, 128>}, {pipeline_mode = #tpu.pipeline_mode<synchronous>, transform_indices = @transform_3, window_bounds = array<i64: 1, 128>}, {pipeline_mode = #tpu.pipeline_mode<synchronous>, transform_indices = @transform_4, window_bounds = array<i64: 3, 128, 128>}, {pipeline_mode = #tpu.pipeline_mode<synchronous>, transform_indices = @transform_5, window_bounds = array<i64: 1, 128>}, {pipeline_mode = #tpu.pipeline_mode<synchronous>, transform_indices = @transform_6, window_bounds = array<i64: 1, 128>}, {pipeline_mode = #tpu.pipeline_mode<synchronous>, transform_indices = @transform_7, window_bounds = array<i64: 128, 128>}, {pipeline_mode = #tpu.pipeline_mode<synchronous>, transform_indices = @transform_8, window_bounds = array<i64: 32, 32>}, {pipeline_mode = #tpu.pipeline_mode<synchronous>, transform_indices = @transform_9, window_bounds = array<i64: 32, 32>}, {pipeline_mode = #tpu.pipeline_mode<synchronous>, transform_indices = @transform_10, window_bounds = array<i64: 32, 128>}]} {
    %c0 = arith.constant 0 : index
    %c0_0 = arith.constant 0 : index
    %0 = vector.load %arg1[%c0, %c0_0] : memref<32x128xf32, #tpu.memory_space<vmem>>, vector<32x128xf32>
    %c0_1 = arith.constant 0 : index
    %c0_2 = arith.constant 0 : index
    %1 = vector.load %arg8[%c0_1, %c0_2] : memref<128x128xf32, #tpu.memory_space<vmem>>, vector<128x128xf32>
    %c0_3 = arith.constant 0 : index
    %c0_4 = arith.constant 0 : index
    %2 = vector.load %arg9[%c0_3, %c0_4] : memref<32x32xf32, #tpu.memory_space<vmem>>, vector<32x32xf32>
    %c0_5 = arith.constant 0 : index
    %c0_6 = arith.constant 0 : index
    %3 = vector.load %arg10[%c0_5, %c0_6] : memref<32x32xf32, #tpu.memory_space<vmem>>, vector<32x32xf32>
    %4 = arith.truncf %0 : vector<32x128xf32> to vector<32x128xbf16>
    %cst = arith.constant dense<0.000000e+00> : vector<32x128xf32>
    %5 = tpu.matmul %2, %0, %cst {dimension_numbers = #tpu.dot_dimension_numbers<[1], [0], [0], [1], [0, 0, 1, 1], [], []>} : vector<32x32xf32>, vector<32x128xf32>, vector<32x128xf32> -> vector<32x128xf32>
    %6 = arith.truncf %5 : vector<32x128xf32> to vector<32x128xbf16>
    %cst_7 = arith.constant dense<0.000000e+00> : vector<32x128xf32>
    %7 = tpu.matmul %3, %0, %cst_7 {dimension_numbers = #tpu.dot_dimension_numbers<[1], [0], [0], [1], [0, 0, 1, 1], [], []>} : vector<32x32xf32>, vector<32x128xf32>, vector<32x128xf32> -> vector<32x128xf32>
    %8 = arith.truncf %7 : vector<32x128xf32> to vector<32x128xbf16>
    %c0_8 = arith.constant 0 : index
    %c0_9 = arith.constant 0 : index
    %c0_10 = arith.constant 0 : index
    %9 = vector.load %arg2[%c0_8, %c0_9, %c0_10] : memref<3x128x128xbf16, #tpu.memory_space<vmem>>, vector<1x128x128xbf16>
    %10 = vector.shape_cast %9 : vector<1x128x128xbf16> to vector<128x128xbf16>
    %cst_11 = arith.constant dense<0.000000e+00> : vector<32x128xf32>
    %11 = tpu.matmul %6, %10, %cst_11 {dimension_numbers = #tpu.dot_dimension_numbers<[1], [0], [0], [1], [0, 0, 1, 1], [], []>} : vector<32x128xbf16>, vector<128x128xbf16>, vector<32x128xf32> -> vector<32x128xf32>
    %c1 = arith.constant 1 : index
    %c0_12 = arith.constant 0 : index
    %c0_13 = arith.constant 0 : index
    %12 = vector.load %arg2[%c1, %c0_12, %c0_13] : memref<3x128x128xbf16, #tpu.memory_space<vmem>>, vector<1x128x128xbf16>
    %13 = vector.shape_cast %12 : vector<1x128x128xbf16> to vector<128x128xbf16>
    %cst_14 = arith.constant dense<0.000000e+00> : vector<32x128xf32>
    %14 = tpu.matmul %4, %13, %cst_14 {dimension_numbers = #tpu.dot_dimension_numbers<[1], [0], [0], [1], [0, 0, 1, 1], [], []>} : vector<32x128xbf16>, vector<128x128xbf16>, vector<32x128xf32> -> vector<32x128xf32>
    %15 = arith.addf %11, %14 : vector<32x128xf32>
    %c2 = arith.constant 2 : index
    %c0_15 = arith.constant 0 : index
    %c0_16 = arith.constant 0 : index
    %16 = vector.load %arg2[%c2, %c0_15, %c0_16] : memref<3x128x128xbf16, #tpu.memory_space<vmem>>, vector<1x128x128xbf16>
    %17 = vector.shape_cast %16 : vector<1x128x128xbf16> to vector<128x128xbf16>
    %cst_17 = arith.constant dense<0.000000e+00> : vector<32x128xf32>
    %18 = tpu.matmul %8, %17, %cst_17 {dimension_numbers = #tpu.dot_dimension_numbers<[1], [0], [0], [1], [0, 0, 1, 1], [], []>} : vector<32x128xbf16>, vector<128x128xbf16>, vector<32x128xf32> -> vector<32x128xf32>
    %19 = arith.addf %15, %18 : vector<32x128xf32>
    %cst_18 = arith.constant dense<0.000000e+00> : vector<128xf32>
    %20 = vector.multi_reduction <add>, %19, %cst_18 [0] : vector<32x128xf32> to vector<128xf32>
    %21 = vector.shape_cast %20 : vector<128xf32> to vector<1x128xf32>
    %22 = arith.mulf %19, %19 : vector<32x128xf32>
    %cst_19 = arith.constant dense<0.000000e+00> : vector<128xf32>
    %23 = vector.multi_reduction <add>, %22, %cst_19 [0] : vector<32x128xf32> to vector<128xf32>
    %24 = vector.shape_cast %23 : vector<128xf32> to vector<1x128xf32>
    %cst_20 = arith.constant dense<0.000000e+00> : vector<1x128xf32>
    %25 = tpu.matmul %21, %1, %cst_20 {dimension_numbers = #tpu.dot_dimension_numbers<[1], [0], [0], [1], [0, 0, 1, 1], [], []>} : vector<1x128xf32>, vector<128x128xf32>, vector<1x128xf32> -> vector<1x128xf32>
    %cst_21 = arith.constant 0.001953125 : f32
    %26 = vector.broadcast %cst_21 : f32 to vector<1x128xf32>
    %27 = arith.mulf %25, %26 : vector<1x128xf32>
    %cst_22 = arith.constant dense<0.000000e+00> : vector<1x128xf32>
    %28 = tpu.matmul %24, %1, %cst_22 {dimension_numbers = #tpu.dot_dimension_numbers<[1], [0], [0], [1], [0, 0, 1, 1], [], []>} : vector<1x128xf32>, vector<128x128xf32>, vector<1x128xf32> -> vector<1x128xf32>
    %cst_23 = arith.constant 0.001953125 : f32
    %29 = vector.broadcast %cst_23 : f32 to vector<1x128xf32>
    %30 = arith.mulf %28, %29 : vector<1x128xf32>
    %31 = arith.mulf %27, %27 : vector<1x128xf32>
    %32 = arith.subf %30, %31 : vector<1x128xf32>
    %cst_24 = arith.constant 0.000000e+00 : f32
    %33 = vector.broadcast %cst_24 : f32 to vector<1x128xf32>
    %34 = arith.maximumf %32, %33 : vector<1x128xf32>
    %cst_25 = arith.constant 9.99999974E-6 : f32
    %35 = vector.broadcast %cst_25 : f32 to vector<1x128xf32>
    %36 = arith.addf %34, %35 : vector<1x128xf32>
    %37 = math.rsqrt %36 : vector<1x128xf32>
    %c0_26 = arith.constant 0 : index
    %c0_27 = arith.constant 0 : index
    %38 = vector.load %arg3[%c0_26, %c0_27] : memref<1x128xf32, #tpu.memory_space<vmem>>, vector<1x128xf32>
    %39 = arith.mulf %37, %38 : vector<1x128xf32>
    %c0_28 = arith.constant 0 : index
    %c0_29 = arith.constant 0 : index
    %40 = vector.load %arg4[%c0_28, %c0_29] : memref<1x128xf32, #tpu.memory_space<vmem>>, vector<1x128xf32>
    %41 = arith.mulf %27, %39 : vector<1x128xf32>
    %42 = arith.subf %40, %41 : vector<1x128xf32>
    %43 = vector.broadcast %39 : vector<1x128xf32> to vector<32x128xf32>
    %44 = arith.mulf %19, %43 : vector<32x128xf32>
    %45 = vector.broadcast %42 : vector<1x128xf32> to vector<32x128xf32>
    %46 = arith.addf %44, %45 : vector<32x128xf32>
    %cst_30 = arith.constant 0.000000e+00 : f32
    %47 = vector.broadcast %cst_30 : f32 to vector<32x128xf32>
    %48 = arith.maximumf %46, %47 : vector<32x128xf32>
    %49 = arith.truncf %48 : vector<32x128xf32> to vector<32x128xbf16>
    %cst_31 = arith.constant dense<0.000000e+00> : vector<32x128xf32>
    %50 = tpu.matmul %2, %48, %cst_31 {dimension_numbers = #tpu.dot_dimension_numbers<[1], [0], [0], [1], [0, 0, 1, 1], [], []>} : vector<32x32xf32>, vector<32x128xf32>, vector<32x128xf32> -> vector<32x128xf32>
    %51 = arith.truncf %50 : vector<32x128xf32> to vector<32x128xbf16>
    %cst_32 = arith.constant dense<0.000000e+00> : vector<32x128xf32>
    %52 = tpu.matmul %3, %48, %cst_32 {dimension_numbers = #tpu.dot_dimension_numbers<[1], [0], [0], [1], [0, 0, 1, 1], [], []>} : vector<32x32xf32>, vector<32x128xf32>, vector<32x128xf32> -> vector<32x128xf32>
    %53 = arith.truncf %52 : vector<32x128xf32> to vector<32x128xbf16>
    %c0_33 = arith.constant 0 : index
    %c0_34 = arith.constant 0 : index
    %c0_35 = arith.constant 0 : index
    %54 = vector.load %arg5[%c0_33, %c0_34, %c0_35] : memref<3x128x128xbf16, #tpu.memory_space<vmem>>, vector<1x128x128xbf16>
    %55 = vector.shape_cast %54 : vector<1x128x128xbf16> to vector<128x128xbf16>
    %cst_36 = arith.constant dense<0.000000e+00> : vector<32x128xf32>
    %56 = tpu.matmul %51, %55, %cst_36 {dimension_numbers = #tpu.dot_dimension_numbers<[1], [0], [0], [1], [0, 0, 1, 1], [], []>} : vector<32x128xbf16>, vector<128x128xbf16>, vector<32x128xf32> -> vector<32x128xf32>
    %c1_37 = arith.constant 1 : index
    %c0_38 = arith.constant 0 : index
    %c0_39 = arith.constant 0 : index
    %57 = vector.load %arg5[%c1_37, %c0_38, %c0_39] : memref<3x128x128xbf16, #tpu.memory_space<vmem>>, vector<1x128x128xbf16>
    %58 = vector.shape_cast %57 : vector<1x128x128xbf16> to vector<128x128xbf16>
    %cst_40 = arith.constant dense<0.000000e+00> : vector<32x128xf32>
    %59 = tpu.matmul %49, %58, %cst_40 {dimension_numbers = #tpu.dot_dimension_numbers<[1], [0], [0], [1], [0, 0, 1, 1], [], []>} : vector<32x128xbf16>, vector<128x128xbf16>, vector<32x128xf32> -> vector<32x128xf32>
    %60 = arith.addf %56, %59 : vector<32x128xf32>
    %c2_41 = arith.constant 2 : index
    %c0_42 = arith.constant 0 : index
    %c0_43 = arith.constant 0 : index
    %61 = vector.load %arg5[%c2_41, %c0_42, %c0_43] : memref<3x128x128xbf16, #tpu.memory_space<vmem>>, vector<1x128x128xbf16>
    %62 = vector.shape_cast %61 : vector<1x128x128xbf16> to vector<128x128xbf16>
    %cst_44 = arith.constant dense<0.000000e+00> : vector<32x128xf32>
    %63 = tpu.matmul %53, %62, %cst_44 {dimension_numbers = #tpu.dot_dimension_numbers<[1], [0], [0], [1], [0, 0, 1, 1], [], []>} : vector<32x128xbf16>, vector<128x128xbf16>, vector<32x128xf32> -> vector<32x128xf32>
    %64 = arith.addf %60, %63 : vector<32x128xf32>
    %cst_45 = arith.constant dense<0.000000e+00> : vector<128xf32>
    %65 = vector.multi_reduction <add>, %64, %cst_45 [0] : vector<32x128xf32> to vector<128xf32>
    %66 = vector.shape_cast %65 : vector<128xf32> to vector<1x128xf32>
    %67 = arith.mulf %64, %64 : vector<32x128xf32>
    %cst_46 = arith.constant dense<0.000000e+00> : vector<128xf32>
    %68 = vector.multi_reduction <add>, %67, %cst_46 [0] : vector<32x128xf32> to vector<128xf32>
    %69 = vector.shape_cast %68 : vector<128xf32> to vector<1x128xf32>
    %cst_47 = arith.constant dense<0.000000e+00> : vector<1x128xf32>
    %70 = tpu.matmul %66, %1, %cst_47 {dimension_numbers = #tpu.dot_dimension_numbers<[1], [0], [0], [1], [0, 0, 1, 1], [], []>} : vector<1x128xf32>, vector<128x128xf32>, vector<1x128xf32> -> vector<1x128xf32>
    %cst_48 = arith.constant 0.001953125 : f32
    %71 = vector.broadcast %cst_48 : f32 to vector<1x128xf32>
    %72 = arith.mulf %70, %71 : vector<1x128xf32>
    %cst_49 = arith.constant dense<0.000000e+00> : vector<1x128xf32>
    %73 = tpu.matmul %69, %1, %cst_49 {dimension_numbers = #tpu.dot_dimension_numbers<[1], [0], [0], [1], [0, 0, 1, 1], [], []>} : vector<1x128xf32>, vector<128x128xf32>, vector<1x128xf32> -> vector<1x128xf32>
    %cst_50 = arith.constant 0.001953125 : f32
    %74 = vector.broadcast %cst_50 : f32 to vector<1x128xf32>
    %75 = arith.mulf %73, %74 : vector<1x128xf32>
    %76 = arith.mulf %72, %72 : vector<1x128xf32>
    %77 = arith.subf %75, %76 : vector<1x128xf32>
    %cst_51 = arith.constant 0.000000e+00 : f32
    %78 = vector.broadcast %cst_51 : f32 to vector<1x128xf32>
    %79 = arith.maximumf %77, %78 : vector<1x128xf32>
    %cst_52 = arith.constant 9.99999974E-6 : f32
    %80 = vector.broadcast %cst_52 : f32 to vector<1x128xf32>
    %81 = arith.addf %79, %80 : vector<1x128xf32>
    %82 = math.rsqrt %81 : vector<1x128xf32>
    %c0_53 = arith.constant 0 : index
    %c0_54 = arith.constant 0 : index
    %83 = vector.load %arg6[%c0_53, %c0_54] : memref<1x128xf32, #tpu.memory_space<vmem>>, vector<1x128xf32>
    %84 = arith.mulf %82, %83 : vector<1x128xf32>
    %c0_55 = arith.constant 0 : index
    %c0_56 = arith.constant 0 : index
    %85 = vector.load %arg7[%c0_55, %c0_56] : memref<1x128xf32, #tpu.memory_space<vmem>>, vector<1x128xf32>
    %86 = arith.mulf %72, %84 : vector<1x128xf32>
    %87 = arith.subf %85, %86 : vector<1x128xf32>
    %88 = vector.broadcast %84 : vector<1x128xf32> to vector<32x128xf32>
    %89 = arith.mulf %64, %88 : vector<32x128xf32>
    %90 = vector.broadcast %87 : vector<1x128xf32> to vector<32x128xf32>
    %91 = arith.addf %89, %90 : vector<32x128xf32>
    %92 = arith.addf %91, %0 : vector<32x128xf32>
    %cst_57 = arith.constant 0.000000e+00 : f32
    %93 = vector.broadcast %cst_57 : f32 to vector<32x128xf32>
    %94 = arith.maximumf %92, %93 : vector<32x128xf32>
    %c0_58 = arith.constant 0 : index
    %c0_59 = arith.constant 0 : index
    %95 = vector.load %arg11[%c0_58, %c0_59] : memref<32x128xf32, #tpu.memory_space<vmem>>, vector<32x128xf32>
    tpu.vector_store %arg11[%c0_58, %c0_59], %94 {strides = array<i32>} : memref<32x128xf32, #tpu.memory_space<vmem>>, vector<32x128xf32>,
    return
  }
  func.func @transform_0(%arg0: i32) -> (i32, i32) {
    %c0_i32 = arith.constant 0 : i32
    %c0_i32_0 = arith.constant 0 : i32
    %c0_i32_1 = arith.constant 0 : i32
    return %c0_i32, %c0_i32_0 : i32, i32
  }
  func.func @transform_1(%arg0: i32) -> (i32, i32, i32) {
    %c0_i32 = arith.constant 0 : i32
    %c0_i32_0 = arith.constant 0 : i32
    %c0_i32_1 = arith.constant 0 : i32
    %c0_i32_2 = arith.constant 0 : i32
    return %c0_i32, %c0_i32_0, %c0_i32_1 : i32, i32, i32
  }
  func.func @transform_2(%arg0: i32) -> (i32, i32) {
    %c0_i32 = arith.constant 0 : i32
    %c0_i32_0 = arith.constant 0 : i32
    %c0_i32_1 = arith.constant 0 : i32
    return %c0_i32, %c0_i32_0 : i32, i32
  }
  func.func @transform_3(%arg0: i32) -> (i32, i32) {
    %c0_i32 = arith.constant 0 : i32
    %c0_i32_0 = arith.constant 0 : i32
    %c0_i32_1 = arith.constant 0 : i32
    return %c0_i32, %c0_i32_0 : i32, i32
  }
  func.func @transform_4(%arg0: i32) -> (i32, i32, i32) {
    %c0_i32 = arith.constant 0 : i32
    %c0_i32_0 = arith.constant 0 : i32
    %c0_i32_1 = arith.constant 0 : i32
    %c0_i32_2 = arith.constant 0 : i32
    return %c0_i32, %c0_i32_0, %c0_i32_1 : i32, i32, i32
  }
  func.func @transform_5(%arg0: i32) -> (i32, i32) {
    %c0_i32 = arith.constant 0 : i32
    %c0_i32_0 = arith.constant 0 : i32
    %c0_i32_1 = arith.constant 0 : i32
    return %c0_i32, %c0_i32_0 : i32, i32
  }
  func.func @transform_6(%arg0: i32) -> (i32, i32) {
    %c0_i32 = arith.constant 0 : i32
    %c0_i32_0 = arith.constant 0 : i32
    %c0_i32_1 = arith.constant 0 : i32
    return %c0_i32, %c0_i32_0 : i32, i32
  }
  func.func @transform_7(%arg0: i32) -> (i32, i32) {
    %c0_i32 = arith.constant 0 : i32
    %c0_i32_0 = arith.constant 0 : i32
    %c0_i32_1 = arith.constant 0 : i32
    return %c0_i32, %c0_i32_0 : i32, i32
  }
  func.func @transform_8(%arg0: i32) -> (i32, i32) {
    %c0_i32 = arith.constant 0 : i32
    %c0_i32_0 = arith.constant 0 : i32
    %c0_i32_1 = arith.constant 0 : i32
    return %c0_i32, %c0_i32_0 : i32, i32
  }
  func.func @transform_9(%arg0: i32) -> (i32, i32) {
    %c0_i32 = arith.constant 0 : i32
    %c0_i32_0 = arith.constant 0 : i32
    %c0_i32_1 = arith.constant 0 : i32
    return %c0_i32, %c0_i32_0 : i32, i32
  }
  func.func @transform_10(%arg0: i32) -> (i32, i32) {
    %c0_i32 = arith.constant 0 : i32
    %c0_i32_0 = arith.constant 0 : i32
    %c0_i32_1 = arith.constant 0 : i32
    return %c0_i32, %c0_i32_0 : i32, i32
  }
}

</mosaic_0001>

<bundles_post_ra>
// kernel: tpu_custom_call.1
= control target key start
LH: loop header
LB: loop body
LE: loop exit
PB: predicated region body
PF: predicated region fallthrough
CT: control target
= control target key end

     0   :  { %15 = vsyncpa [#allocation3], 0  ;;  %s2971_s0 = inlined_call_operand.hbm [shape: f32[32,128], index: 0, kind: input, shape index: {}]   ;;  %s2972_s1 = inlined_call_operand.hbm [shape: bf16[3,128,128], index: 1, kind: input, shape index: {}]   ;;  %s2973_s2 = inlined_call_operand.vmem [shape: f32[1,128], index: 2, kind: input, shape index: {}]   ;;  %s2974_s3 = inlined_call_operand.vmem [shape: f32[1,128], index: 3, kind: input, shape index: {}]   ;;  %s2975_s4 = inlined_call_operand.hbm [shape: bf16[3,128,128], index: 4, kind: input, shape index: {}]   ;;  %s2976_s5 = inlined_call_operand.hbm [shape: f32[1,128], index: 5, kind: input, shape index: {}]   ;;  %s2977_s6 = inlined_call_operand.hbm [shape: f32[1,128], index: 6, kind: input, shape index: {}]   ;;  %s2978_s7 = inlined_call_operand.hbm [shape: f32[128,128], index: 7, kind: input, shape index: {}]   ;;  %s2979_s8 = inlined_call_operand.hbm [shape: f32[32,32], index: 8, kind: input, shape index: {}]   ;;  %s2980_s9 = inlined_call_operand.vmem [shape: f32[32,32], index: 9, kind: input, shape index: {}]   ;;  %s2981_s10 = inlined_call_operand.hbm [shape: f32[32,128], index: 10, kind: output, shape index: {}]  }
   0x1   :  { %16 = vsyncpa [#allocation6], 0 }
   0x2   :  { %17 = vsyncpa [#allocation9], 0 }
   0x3   :  { %18 = vsyncpa [#allocation12], 0 }
   0x4   :  { %19 = vsyncpa [#allocation4], 0  ;;  %s2584_s13 = smov [#allocation5]   ;;  %s2398_s17 = scalar_lea.hbm %s2972_s1, 3072 }
   0x5   :  { %s37_s14 = sshll.u32 %s2584_s13, 4  ;;  %p2399_p0 = scmp.ne.s32.totalorder %s2972_s1, %s2398_s17  ;;  %s38_s14 = int_to_ptr.vmem [resolvable:$true] %s37_s14 }
   0x6   :  { %p2402_p1 = scmp.lt.u32.totalorder %s2398_s17, %s2972_s1 }
   0x8   :  { %p2404_p2 = pnand %p2402_p1, %p2399_p0 }
   0xa   :  { %2407 = shalt.err (!%p2404_p2)
}
   0xb   :  { %s2408_s22 = scalar_lea.vmem %s38_s14, 3072  ;;  %p2413_p4 = scmp.lt.s32.totalorder %s38_s14, %s38_s14 }
   0xc   :  { %p2409_p3 = scmp.ne.s32.totalorder %s38_s14, %s2408_s22  ;;  %p2414_p5 = scmp.lt.s32.totalorder %s2408_s22, %s2408_s22 }
   0xe   :  { %p2415_p6 = por %p2414_p5, %p2413_p4 }
  0x10   :  { %p2416_p7 = pnand %p2415_p6, %p2409_p3 }
  0x12   :  { %2419 = shalt.err (!%p2416_p7)
}
  0x13   :  { %s2585_s23 = smov 64   ;;  %s2586_s24 = smov 4  }
  0x14   :  { %43 = dma.hbm_to_vmem [thread:$0]  %s2972_s1, 3072, %s38_s14, [#allocation6], %s2585_s23, %s2585_s23, %s2586_s24  }
  0x15   :  { %s2587_s27 = smov [#allocation8]   ;;  %s2420_s11 = scalar_lea.hbm %s2976_s5, 16 }
  0x16   :  { %s66_s28 = sshll.u32 %s2587_s27, 4  ;;  %p2421_p8 = scmp.ne.s32.totalorder %s2976_s5, %s2420_s11  ;;  %s67_s28 = int_to_ptr.vmem [resolvable:$true] %s66_s28 }
  0x17   :  { %p2424_p9 = scmp.lt.u32.totalorder %s2420_s11, %s2976_s5 }
  0x19   :  { %p2426_p10 = pnand %p2424_p9, %p2421_p8 }
  0x1b   :  { %2429 = shalt.err (!%p2426_p10)
}
  0x1c   :  { %s2430_s17 = scalar_lea.vmem %s67_s28, 16  ;;  %s2434_s1 = scalar_lea.vmem %s67_s28, 32 }
  0x1d   :  { %p2431_p11 = scmp.ne.s32.totalorder %s67_s28, %s2430_s17  ;;  %p2435_p12 = scmp.lt.s32.totalorder %s67_s28, %s67_s28 }
  0x1e   :  { %p2436_p13 = scmp.lt.s32.totalorder %s2434_s1, %s2430_s17 }
  0x20   :  { %p2437_p0 = por %p2436_p13, %p2435_p12 }
  0x22   :  { %p2438_p1 = pnand %p2437_p0, %p2431_p11 }
  0x24   :  { %2441 = shalt.err (!%p2438_p1)
}
  0x25   :  { %69 = dma.hbm_to_vmem [thread:$0]  %s2976_s5, 16, %s67_s28, [#allocation9]  }
  0x26   :  { %s2588_s19 = smov [#allocation11]   ;;  %s2589_s21 = smov [#allocation2]  }
  0x27   :  { %s85_s20 = sshll.u32 %s2588_s19, 4  ;;  %s25_s22 = sshll.u32 %s2589_s21, 4  ;;  %s86_s20 = int_to_ptr.vmem [resolvable:$true] %s85_s20  ;;  %s2681_s22 = int_to_ptr.vmem [resolvable:$true] %s25_s22 }
  0x28   :  { %s2442_s27 = scalar_lea.hbm %s2978_s7, 2048 }
  0x29   :  { %p2443_p2 = scmp.ne.s32.totalorder %s2978_s7, %s2442_s27  ;;  %p2446_p3 = scmp.lt.u32.totalorder %s2442_s27, %s2978_s7 }
  0x2b   :  { %p2448_p4 = pnand %p2446_p3, %p2443_p2 }
  0x2d   :  { %2451 = shalt.err (!%p2448_p4)
}
  0x2e   :  { %s2452_s5 = scalar_lea.vmem %s86_s20, 2048  ;;  %p2457_p6 = scmp.lt.s32.totalorder %s86_s20, %s86_s20 }
  0x2f   :  { %p2453_p5 = scmp.ne.s32.totalorder %s86_s20, %s2452_s5  ;;  %p2458_p7 = scmp.lt.s32.totalorder %s2452_s5, %s2452_s5 }
  0x31   :  { %p2459_p8 = por %p2458_p7, %p2457_p6 }
  0x33   :  { %p2460_p9 = pnand %p2459_p8, %p2453_p5 }
  0x35   :  { %2463 = shalt.err (!%p2460_p9)
}
  0x36   :  { %s2590_s28 = smov 128   ;;  %s2591_s13 = smov 8  }
  0x37   :  { %91 = dma.hbm_to_vmem [thread:$0]  %s2978_s7, 2048, %s86_s20, [#allocation12], %s2590_s28, %s2590_s28, %s2591_s13  }
  0x38   :  { %s2464_s14 = scalar_lea.hbm %s2971_s0, 512 }
  0x39   :  { %p2465_p10 = scmp.ne.s32.totalorder %s2971_s0, %s2464_s14  ;;  %p2468_p11 = scmp.lt.u32.totalorder %s2464_s14, %s2971_s0 }
  0x3b   :  { %p2470_p12 = pnand %p2468_p11, %p2465_p10 }
  0x3d   :  { %2473 = shalt.err (!%p2470_p12)
}
  0x3e   :  { %s2474_s26 = scalar_lea.vmem %s2681_s22, 512  ;;  %p2479_p0 = scmp.lt.s32.totalorder %s2681_s22, %s2681_s22 }
  0x3f   :  { %p2475_p13 = scmp.ne.s32.totalorder %s2681_s22, %s2474_s26  ;;  %p2480_p1 = scmp.lt.s32.totalorder %s2474_s26, %s2474_s26 }
  0x41   :  { %p2481_p2 = por %p2480_p1, %p2479_p0 }
  0x43   :  { %p2482_p3 = pnand %p2481_p2, %p2475_p13 }
  0x45   :  { %2485 = shalt.err (!%p2482_p3)
}
  0x46   :  { %31 = dma.hbm_to_vmem [thread:$0]  %s2971_s0, 512, %s2681_s22, [#allocation3], %s2590_s28, %s2590_s28, %s2591_s13  }
  0x47   :  { %s2592_s27 = smov [#allocation7]   ;;  %s2593_s30 = smov [#allocation10]  }
  0x48   :  { %s53_s29 = sshll.u32 %s2592_s27, 4  ;;  %s76_s11 = sshll.u32 %s2593_s30, 4  ;;  %s54_s29 = int_to_ptr.vmem [resolvable:$true] %s53_s29  ;;  %s77_s11 = int_to_ptr.vmem [resolvable:$true] %s76_s11 }
  0x49   :  { %s2486_s15 = scalar_lea.hbm %s2975_s4, 3072 }
  0x4a   :  { %p2487_p4 = scmp.ne.s32.totalorder %s2975_s4, %s2486_s15  ;;  %p2490_p5 = scmp.lt.u32.totalorder %s2486_s15, %s2975_s4 }
  0x4c   :  { %p2492_p6 = pnand %p2490_p5, %p2487_p4 }
  0x4e   :  { %2495 = shalt.err (!%p2492_p6)
}
  0x4f   :  { %s2496_s0 = scalar_lea.vmem %s54_s29, 3072  ;;  %p2501_p8 = scmp.lt.s32.totalorder %s54_s29, %s54_s29 }
  0x50   :  { %p2497_p7 = scmp.ne.s32.totalorder %s54_s29, %s2496_s0  ;;  %p2502_p9 = scmp.lt.s32.totalorder %s2496_s0, %s2496_s0 }
  0x52   :  { %p2503_p10 = por %p2502_p9, %p2501_p8 }
  0x54   :  { %p2504_p11 = pnand %p2503_p10, %p2497_p7 }
  0x56   :  { %2507 = shalt.err (!%p2504_p11)
}
  0x57   :  { %59 = dma.hbm_to_vmem [thread:$0]  %s2975_s4, 3072, %s54_s29, [#allocation6], %s2585_s23, %s2585_s23, %s2586_s24  }
  0x58   :  { %s2508_s25 = scalar_lea.hbm %s2977_s6, 16 }
  0x59   :  { %p2509_p12 = scmp.ne.s32.totalorder %s2977_s6, %s2508_s25  ;;  %p2512_p13 = scmp.lt.u32.totalorder %s2508_s25, %s2977_s6 }
  0x5b   :  { %p2514_p0 = pnand %p2512_p13, %p2509_p12 }
  0x5d   :  { %2517 = shalt.err (!%p2514_p0)
}
  0x5e   :  { %s2518_s30 = scalar_lea.vmem %s77_s11, 16  ;;  %s2522_s12 = scalar_lea.vmem %s77_s11, 32 }
  0x5f   :  { %p2519_p1 = scmp.ne.s32.totalorder %s77_s11, %s2518_s30  ;;  %p2523_p2 = scmp.lt.s32.totalorder %s77_s11, %s77_s11 }
  0x60   :  { %p2524_p3 = scmp.lt.s32.totalorder %s2522_s12, %s2518_s30 }
  0x62   :  { %p2525_p4 = por %p2524_p3, %p2523_p2 }
  0x64   :  { %p2526_p5 = pnand %p2525_p4, %p2519_p1 }
  0x66   :  { %2529 = shalt.err (!%p2526_p5)
}
  0x67   :  { %79 = dma.hbm_to_vmem [thread:$0]  %s2977_s6, 16, %s77_s11, [#allocation9]  }
  0x68   :  { %s2594_s24 = smov [#allocation13]   ;;  %s2530_s16 = scalar_lea.hbm %s2979_s8, 512 }
  0x69   :  { %s97_s29 = sshll.u32 %s2594_s24, 4  ;;  %p2531_p6 = scmp.ne.s32.totalorder %s2979_s8, %s2530_s16  ;;  %s98_s29 = int_to_ptr.vmem [resolvable:$true] %s97_s29 }
  0x6a   :  { %p2534_p7 = scmp.lt.u32.totalorder %s2530_s16, %s2979_s8 }
  0x6c   :  { %p2536_p8 = pnand %p2534_p7, %p2531_p6 }
  0x6e   :  { %2539 = shalt.err (!%p2536_p8)
}
  0x6f   :  { %s2540_s22 = scalar_lea.vmem %s98_s29, 512  ;;  %p2545_p10 = scmp.lt.s32.totalorder %s98_s29, %s98_s29 }
  0x70   :  { %p2541_p9 = scmp.ne.s32.totalorder %s98_s29, %s2540_s22  ;;  %p2546_p11 = scmp.lt.s32.totalorder %s2540_s22, %s2540_s22 }
  0x72   :  { %p2547_p12 = por %p2546_p11, %p2545_p10 }
  0x74   :  { %p2548_p13 = pnand %p2547_p12, %p2541_p9 }
  0x76   :  { %2551 = shalt.err (!%p2548_p13)
}
  0x77   :  { %103 = dma.hbm_to_vmem [thread:$0]  %s2979_s8, 512, %s98_s29, [#allocation12], %s2590_s28, %s2590_s28, %s2591_s13  }
  0x78   :  { %2574 = dma.done.wait [#allocation3], 512  }
  0x79   :  { %2575 = vsyncadd [#allocation3], 4294966784 }
  0x7a   :  { %2576 = dma.done.wait [#allocation6], 6144  }
  0x7b   :  { %2577 = vsyncadd [#allocation6], 4294961152 }
  0x7c   :  { %2578 = dma.done.wait [#allocation9], 32  }
  0x7d   :  { %2579 = vsyncadd [#allocation9], 4294967264 }
  0x7e   :  { %2580 = dma.done.wait [#allocation12], 2560  }
  0x7f   :  { %2581 = vsyncadd [#allocation12], 4294964736  ;;  %vm158_vm0 = vcmask 261120   ;;  %v128_v0 = vld [vmem:[#allocation2] sm:$0xff]  ;;  %v129_v1 = vld [vmem:[#allocation2 + $0x8] sm:$0xff]  ;;  %v2595_v34 = vmov 0.0|0.0  }
  0x80   :  { %v130_v2 = vld [vmem:[#allocation2 + $0x10] sm:$0xff]  ;;  %v156_v3 = vpack.c.bf16 %v129_v1, %v128_v0  ;;  %v131_v4 = vld [vmem:[#allocation2 + $0x18] sm:$0xff]  ;;  %v2760_v5 = vld [vmem:[#allocation13] sm:$0xff]  ;;  %2199 = vmatprep.subr.bf16.mxu1 %v2595_v34  ;;  %vm2596_vm1 = vmmov 0  }
  0x81   :  { %v157_v6 = vpack.c.bf16 %v131_v4, %v130_v2  ;;  %1875 = vmatprep.mubr.msk.f32.mxu0 %vm158_vm0, %v2760_v5  ;;  %v2764_v7 = vld [vmem:[#allocation13 + $0x8] sm:$0xff]  ;;  %v2766_v8 = vld [vmem:[#allocation13 + $0x10] sm:$0xff]  ;;  %v2770_v9 = vld [vmem:[#allocation13 + $0x18] sm:$0xff] }
  0x82   :  { %2184 = vmatprep.subr.bf16.mxu0 %v156_v3  ;;  %v2777_v10 = vld [vmem:[%s2980_s9] sm:$0xff]  ;;  %v2784_v12 = vld [vmem:[%s2980_s9 + $0x8] sm:$0xff]  ;;  %v2791_v13 = vld [vmem:[%s2980_s9 + $0x10] sm:$0xff] }
  0x83   :  { %2186 = vmatpush3.bf16.msra.mxu0 %v156_v3  ;;  %v2342_v11 = vld [vmem:[#allocation5 + $0x40] sm:$0xff]   ;;  %v2343_v14 = vld [vmem:[#allocation5 + $0x48] sm:$0xff]   ;;  %v2796_v15 = vld [vmem:[%s2980_s9 + $0x18] sm:$0xff] }
  0x84   :  { %2188 = vmatprep.subr.bf16.mxu0 %v157_v6  ;;  %v2344_v16 = vld [vmem:[#allocation5 + $0x50] sm:$0xff]   ;;  %v2345_v17 = vld [vmem:[#allocation5 + $0x58] sm:$0xff]   ;;  %v2346_v18 = vld [vmem:[#allocation5 + $0x60] sm:$0xff]  }
  0x85   :  { %v2347_v19 = vld [vmem:[#allocation5 + $0x68] sm:$0xff]   ;;  %v2348_v20 = vld [vmem:[#allocation5 + $0x70] sm:$0xff]   ;;  %v2349_v21 = vld [vmem:[#allocation5 + $0x78] sm:$0xff]  }
  0x86   :  { %v2350_v22 = vld [vmem:[#allocation5] sm:$0xff]   ;;  %v2351_v23 = vld [vmem:[#allocation5 + $0x8] sm:$0xff]   ;;  %v2352_v24 = vld [vmem:[#allocation5 + $0x10] sm:$0xff]  }
  0x87   :  { %2190 = vmatpush3.bf16.msra.mxu0 %v157_v6  ;;  %v2353_v25 = vld [vmem:[#allocation5 + $0x18] sm:$0xff]   ;;  %v2354_v26 = vld [vmem:[#allocation5 + $0x20] sm:$0xff]   ;;  %v2355_v27 = vld [vmem:[#allocation5 + $0x28] sm:$0xff]  }
  0x88   :  { %2192 = vmatprep.subr.bf16.mxu0 %v156_v3  ;;  %v2356_v28 = vld [vmem:[#allocation5 + $0x30] sm:$0xff]   ;;  %v2357_v29 = vld [vmem:[#allocation5 + $0x38] sm:$0xff]   ;;  %v2358_v30 = vld [vmem:[#allocation5 + $0x80] sm:$0xff]  }
  0x89   :  { %v132_v31 = vld [vmem:[#allocation11] sm:$0xff]  ;;  %v133_v32 = vld [vmem:[#allocation11 + $0x8] sm:$0xff]  ;;  %v134_v33 = vld [vmem:[#allocation11 + $0x10] sm:$0xff] }
  0x8a   :  { %1876 = vmatmul.mubr.msk.f32.vlgmr.msra.gmra.mrb[0].mxu0 %vm158_vm0, %v2764_v7  ;;  %v2805_v35 = vpack.c.bf16 %v133_v32, %v132_v31  ;;  %v135_v36 = vld [vmem:[#allocation11 + $0x18] sm:$0xff]  ;;  %v136_v38 = vld [vmem:[#allocation11 + $0x20] sm:$0xff]  ;;  %v137_v39 = vld [vmem:[#allocation11 + $0x28] sm:$0xff] }
  0x8b   :  { %1878 = vmatprep.mubr.msk.f32.mxu0 %vm158_vm0, %v2766_v8  ;;  %2194 = vmatpush3.bf16.msra.mxu0 %v156_v3  ;;  %v2808_v37 = vpack.c.bf16 %v135_v36, %v134_v33  ;;  %v2812_v40 = vpack.c.bf16 %v137_v39, %v136_v38  ;;  %v2359_v47 = vld [vmem:[#allocation5 + $0x88] sm:$0xff]   ;;  %v2360_v50 = vld [vmem:[#allocation5 + $0x90] sm:$0xff]   ;;  %v2361_v54 = vld [vmem:[#allocation5 + $0x98] sm:$0xff]  }
  0x8c   :  { %2196 = vmatprep.subr.bf16.mxu0 %v157_v6  ;;  %2201 = vmatpush3.bf16.msra.mxu1 %v2805_v35  ;;  %v2362_v56 = vld [vmem:[#allocation5 + $0xa0] sm:$0xff]   ;;  %v2363_v57 = vld [vmem:[#allocation5 + $0xa8] sm:$0xff]   ;;  %v2364_v58 = vld [vmem:[#allocation5 + $0xb0] sm:$0xff]  }
  0x8d   :  { %2202 = vmatprep.subr.bf16.mxu1 %v2595_v34  ;;  %v2365_v59 = vld [vmem:[#allocation5 + $0xb8] sm:$0xff]   ;;  %v140_v63 = vld [vmem:[#allocation11 + $0x40] sm:$0xff]  ;;  %v141_v0 = vld [vmem:[#allocation11 + $0x48] sm:$0xff] }
  0x8e   :  { %1879 = vmatmul.mubr.msk.f32.gmra.mrb[2].mxu0 %vm158_vm0, %v2770_v9  ;;  %v138_v60 = vld [vmem:[#allocation11 + $0x30] sm:$0xff]  ;;  %v139_v61 = vld [vmem:[#allocation11 + $0x38] sm:$0xff]  ;;  %v2830_v1 = vpack.c.bf16 %v141_v0, %v140_v63 }
  0x8f   :  { %2198 = vmatpush3.bf16.msra.mxu0 %v157_v6  ;;  %1889 = vmatprep.mubr.msk.f32.mxu0 %vm158_vm0, %v2777_v10  ;;  %v2824_v62 = vpack.c.bf16 %v139_v61, %v138_v60  ;;  %v142_v2 = vld [vmem:[#allocation11 + $0x50] sm:$0xff]  ;;  %v876_v60 = vlaneseq  ;;  %v871_v63 = vld [vmem:[%s2973_s2] sm:$0x1]  ;;  %s2598_s2 = smov [#allocation14]  }
  0x90   :  { %1895 = vmatprep.subr.bf16.mxu0 %v2342_v11  ;;  %2204 = vmatpush3.bf16.msra.mxu1 %v2808_v37 }
  0x91   :  { %2205 = vmatprep.subr.bf16.mxu1 %v2595_v34  ;;  %v877_v61 = vshrl.u32 %v876_v60, 7 }
  0x92   :  { %1890 = vmatmul.mubr.msk.f32.vlgmr.msra.gmra.mrb[4].mxu0 %vm158_vm0, %v2784_v12 }
  0x93   :  { %1892 = vmatprep.mubr.msk.f32.mxu0 %vm158_vm0, %v2791_v13  ;;  %1896 = vmatpush3.bf16.msra.mxu0 %v2342_v11  ;;  %v145_v11 = vld [vmem:[#allocation11 + $0x68] sm:$0xff]  ;;  %v2900_v0 = vsub.s32 0, %v877_v61  ;;  %v2385_v61 = vld [vmem:[#allocation7 + $0x98] sm:$0xff]  }
  0x94   :  { %1897 = vmatprep.subr.bf16.mxu0 %v2343_v14  ;;  %2207 = vmatpush3.bf16.msra.mxu1 %v2812_v40 }
  0x95   :  { %2208 = vmatprep.subr.bf16.mxu1 %v2595_v34 }
  0x96   :  { %1893 = vmatmul.mubr.msk.f32.gmra.mrb[6].mxu0 %vm158_vm0, %v2796_v15 }
  0x97   :  { %1898 = vmatpush3.bf16.msra.mxu0 %v2343_v14  ;;  %1911 = vmatprep.mubr.bf16.mxu0 %v156_v3  ;;  %v143_v3 = vld [vmem:[#allocation11 + $0x58] sm:$0xff] }
  0x98   :  { %1899 = vmatprep.subr.bf16.mxu0 %v2344_v16  ;;  %2210 = vmatpush3.bf16.msra.mxu1 %v2824_v62  ;;  %v2836_v4 = vpack.c.bf16 %v143_v3, %v142_v2  ;;  %v873_v3 = vld [vmem:[%s2974_s3] sm:$0x1]  ;;  %s1628_s3 = sshll.u32 %s2598_s2, 4  ;;  %s1629_s3 = int_to_ptr.vmem [resolvable:$true] %s1628_s3 }
  0x99   :  { %2211 = vmatprep.subr.bf16.mxu1 %v2595_v34  ;;  %s2552_s4 = scalar_lea.vmem %s1629_s3, 512  ;;  %p2557_p1 = scmp.lt.s32.totalorder %s1629_s3, %s1629_s3 }
  0x9a   :  { %p2553_p0 = scmp.ne.s32.totalorder %s1629_s3, %s2552_s4  ;;  %p2558_p2 = scmp.lt.s32.totalorder %s2552_s4, %s2552_s4 }
  0x9b   :  { %1900 = vmatpush3.bf16.msra.mxu0 %v2344_v16  ;;  %v146_v16 = vld [vmem:[#allocation11 + $0x70] sm:$0xff] }
  0x9c   :  { %1901 = vmatprep.subr.bf16.mxu0 %v2345_v17  ;;  %2213 = vmatpush3.bf16.msra.mxu1 %v2830_v1  ;;  %p2559_p3 = por %p2558_p2, %p2557_p1 }
  0x9d   :  { %2214 = vmatprep.subr.bf16.mxu1 %v2595_v34 }
  0x9e   :  { %p2560_p4 = pnand %p2559_p3, %p2553_p0 }
  0x9f   :  { %1902 = vmatpush3.bf16.msra.mxu0 %v2345_v17  ;;  %v147_v17 = vld [vmem:[#allocation11 + $0x78] sm:$0xff] }
  0xa0   :  { %1903 = vmatprep.subr.bf16.mxu0 %v2346_v18  ;;  %2216 = vmatpush3.bf16.msra.mxu1 %v2836_v4 }
  0xa1   :  { %2217 = vmatprep.subr.bf16.mxu1 %v2595_v34 }
  0xa3   :  { %1904 = vmatpush3.bf16.msra.mxu0 %v2346_v18  ;;  %v2597_v18 = vmov 0.0  }
  0xa4   :  { %1905 = vmatprep.subr.bf16.mxu0 %v2347_v19  ;;  %1987 = vmatprep.mubr.msk.f32.mxu1 %vm2596_vm1, %v2597_v18 }
  0xa7   :  { %1906 = vmatpush3.bf16.msra.mxu0 %v2347_v19  ;;  %v2849_v19 = vpack.c.bf16 %v147_v17, %v146_v16 }
  0xa8   :  { %1907 = vmatprep.subr.bf16.mxu0 %v2348_v20 }
  0xab   :  { %1908 = vmatpush3.bf16.msra.mxu0 %v2348_v20 }
  0xac   :  { %1909 = vmatprep.subr.bf16.mxu0 %v2349_v21 }
  0xaf   :  { %1910 = vmatpush3.bf16.msra.mxu0 %v2349_v21 }
  0xb0   :  { %1915 = vmatprep.subr.bf16.mxu0 %v2350_v22 }
  0xb2   :  { %1912 = vmatmul.mubr.bf16.vlgmr.msra.gmra.mrb[8].mxu0 %v157_v6  ;;  %v144_v6 = vld [vmem:[#allocation11 + $0x60] sm:$0xff] }
  0xb3   :  { %1916 = vmatpush3.bf16.msra.mxu0 %v2350_v22  ;;  %v2842_v14 = vpack.c.bf16 %v145_v11, %v144_v6 }
  0xb4   :  { %1917 = vmatprep.subr.bf16.mxu0 %v2351_v23 }
  0xb5   :  { %2219 = vmatpush3.bf16.msra.mxu1 %v2842_v14 }
  0xb6   :  { %2220 = vmatprep.subr.bf16.mxu1 %v2595_v34 }
  0xb7   :  { %1918 = vmatpush3.bf16.msra.mxu0 %v2351_v23 }
  0xb8   :  { %1919 = vmatprep.subr.bf16.mxu0 %v2352_v24 }
  0xb9   :  { %2222 = vmatpush3.bf16.msra.mxu1 %v2849_v19 }
  0xba   :  { %2223 = vmatprep.subr.bf16.mxu1 %v2595_v34 }
  0xbb   :  { %1920 = vmatpush3.bf16.msra.mxu0 %v2352_v24 }
  0xbc   :  { %1921 = vmatprep.subr.bf16.mxu0 %v2353_v25 }
  0xbf   :  { %1922 = vmatpush3.bf16.msra.mxu0 %v2353_v25 }
  0xc0   :  { %1923 = vmatprep.subr.bf16.mxu0 %v2354_v26 }
  0xc3   :  { %1924 = vmatpush3.bf16.msra.mxu0 %v2354_v26 }
  0xc4   :  { %1925 = vmatprep.subr.bf16.mxu0 %v2355_v27 }
  0xc7   :  { %1926 = vmatpush3.bf16.msra.mxu0 %v2355_v27 }
  0xc8   :  { %1927 = vmatprep.subr.bf16.mxu0 %v2356_v28 }
  0xcb   :  { %1928 = vmatpush3.bf16.msra.mxu0 %v2356_v28 }
  0xcc   :  { %1929 = vmatprep.subr.bf16.mxu0 %v2357_v29 }
  0xcf   :  { %1930 = vmatpush3.bf16.msra.mxu0 %v2357_v29 }
  0xd0   :  { %1935 = vmatprep.subr.bf16.mxu0 %v2358_v30 }
 0x15d   :  { %v1877_v41 = vpop.f32.mrb[0].mxu0 }
 0x15e   :  { %v237_v42 = vpop.f32.mrb[1].mxu0 }
 0x15f   :  { %v256_v43 = vpack.c.bf16 %v1877_v41, %v237_v42 }
 0x161   :  { %v1880_v44 = vpop.f32.mrb[2].mxu0  ;;  %1931 = vmatprep.mubr.bf16.mxu0 %v256_v43 }
 0x162   :  { %v247_v45 = vpop.f32.mrb[3].mxu0 }
 0x163   :  { %v257_v46 = vpack.c.bf16 %v1880_v44, %v247_v45 }
 0x165   :  { %1932 = vmatmul.mubr.bf16.vlgmr.msra.gmra.mrb[8].mxu0 %v257_v46  ;;  %v1891_v48 = vpop.f32.mrb[4].mxu0 }
 0x166   :  { %1936 = vmatpush3.bf16.msra.mxu0 %v2358_v30  ;;  %v336_v49 = vpop.f32.mrb[5].mxu0 }
 0x167   :  { %1937 = vmatprep.subr.bf16.mxu0 %v2359_v47  ;;  %v355_v51 = vpack.c.bf16 %v1891_v48, %v336_v49 }
 0x169   :  { %v1894_v52 = vpop.f32.mrb[6].mxu0  ;;  %1951 = vmatprep.mubr.bf16.mxu0 %v355_v51 }
 0x16a   :  { %1938 = vmatpush3.bf16.msra.mxu0 %v2359_v47  ;;  %v346_v53 = vpop.f32.mrb[7].mxu0 }
 0x16b   :  { %1939 = vmatprep.subr.bf16.mxu0 %v2360_v50  ;;  %v356_v55 = vpack.c.bf16 %v1894_v52, %v346_v53 }
 0x16e   :  { %1940 = vmatpush3.bf16.msra.mxu0 %v2360_v50 }
 0x16f   :  { %1941 = vmatprep.subr.bf16.mxu0 %v2361_v54 }
 0x172   :  { %1942 = vmatpush3.bf16.msra.mxu0 %v2361_v54 }
 0x173   :  { %1943 = vmatprep.subr.bf16.mxu0 %v2362_v56 }
 0x176   :  { %1944 = vmatpush3.bf16.msra.mxu0 %v2362_v56 }
 0x177   :  { %1945 = vmatprep.subr.bf16.mxu0 %v2363_v57 }
 0x17a   :  { %1946 = vmatpush3.bf16.msra.mxu0 %v2363_v57 }
 0x17b   :  { %1947 = vmatprep.subr.bf16.mxu0 %v2364_v58 }
 0x17e   :  { %1948 = vmatpush3.bf16.msra.mxu0 %v2364_v58 }
 0x17f   :  { %1949 = vmatprep.subr.bf16.mxu0 %v2365_v59 }
 0x182   :  { %1950 = vmatpush3.bf16.msra.mxu0 %v2365_v59 }
 0x183   :  { %2263 = vmatprep.subr.bf16.mxu0 %v2595_v34 }
 0x185   :  { %1952 = vmatmul.mubr.bf16.vlgmr.msra.gmra.mrb[8].mxu0 %v356_v55 }
 0x186   :  { %2265 = vmatpush3.bf16.msra.mxu0 %v2805_v35  ;;  %2145 = vmatprep.mubr.msk.f32.mxu0 %vm2596_vm1, %v2597_v18 }
 0x187   :  { %2266 = vmatprep.subr.bf16.mxu0 %v2595_v34 }
 0x18a   :  { %2268 = vmatpush3.bf16.msra.mxu0 %v2808_v37 }
 0x18b   :  { %2269 = vmatprep.subr.bf16.mxu0 %v2595_v34 }
 0x18e   :  { %2271 = vmatpush3.bf16.msra.mxu0 %v2812_v40 }
 0x18f   :  { %2272 = vmatprep.subr.bf16.mxu0 %v2595_v34 }
 0x192   :  { %2274 = vmatpush3.bf16.msra.mxu0 %v2824_v62 }
 0x193   :  { %2275 = vmatprep.subr.bf16.mxu0 %v2595_v34 }
 0x196   :  { %2277 = vmatpush3.bf16.msra.mxu0 %v2830_v1 }
 0x197   :  { %2278 = vmatprep.subr.bf16.mxu0 %v2595_v34 }
 0x19a   :  { %2280 = vmatpush3.bf16.msra.mxu0 %v2836_v4 }
 0x19b   :  { %2281 = vmatprep.subr.bf16.mxu0 %v2595_v34 }
 0x19e   :  { %2283 = vmatpush3.bf16.msra.mxu0 %v2842_v14 }
 0x19f   :  { %2284 = vmatprep.subr.bf16.mxu0 %v2595_v34 }
 0x1a2   :  { %2286 = vmatpush3.bf16.msra.mxu0 %v2849_v19 }
 0x1a3   :  { %2287 = vmatprep.subr.bf16.mxu0 %v2595_v34 }
 0x258   :  { %v2858_v20 = vpop.f32.mrb[8].mxu0 }
 0x259   :  { %v2860_v21 = vpop.f32.mrb[9].mxu0  ;;  %v713_v27 = vmul.f32 %v2858_v20, %v2858_v20 }
 0x25a   :  { %v2862_v22 = vpop.f32.mrb[10].mxu0  ;;  %v711_v24 = vmul.f32 %v2860_v21, %v2860_v21 }
 0x25b   :  { %v2864_v23 = vpop.f32.mrb[11].mxu0  ;;  %v714_v30 = vmul.f32 %v2862_v22, %v2862_v22 }
 0x25c   :  { %v702_v25 = vadd.f32 %v2864_v23, %v2860_v21  ;;  %v712_v26 = vmul.f32 %v2864_v23, %v2864_v23 }
 0x25e   :  { %v703_v28 = vadd.f32 %v2858_v20, %v702_v25  ;;  %v715_v29 = vadd.f32 %v712_v26, %v711_v24 }
 0x260   :  { %v704_v31 = vadd.f32 %v2862_v22, %v703_v28  ;;  %v716_v32 = vadd.f32 %v715_v29, %v713_v27 }
 0x262   :  { %v705_v33 = vrot.slane %v704_v31, 4  ;;  %v717_v36 = vadd.f32 %v716_v32, %v714_v30 }
 0x264   :  { %v706_v38 = vadd.f32 %v705_v33, %v704_v31  ;;  %v718_v44 = vrot.slane %v717_v36, 4 }
 0x266   :  { %v707_v39 = vrot.slane %v706_v38, 2  ;;  %v719_v45 = vadd.f32 %v718_v44, %v717_v36  ;;  %v2379_v44 = vld [vmem:[#allocation7 + $0x28] sm:$0xff]  }
 0x268   :  { %v708_v41 = vadd.f32 %v707_v39, %v706_v38  ;;  %v720_v46 = vrot.slane %v719_v45, 2 }
 0x26a   :  { %v709_v42 = vrot.slane %v708_v41, 1  ;;  %v721_v47 = vadd.f32 %v720_v46, %v719_v45  ;;  %v2380_v45 = vld [vmem:[#allocation7 + $0x30] sm:$0xff]   ;;  %v2381_v46 = vld [vmem:[#allocation7 + $0x38] sm:$0xff]  }
 0x26c   :  { %v710_v43 = vadd.f32 %v709_v42, %v708_v41  ;;  %v722_v48 = vrot.slane %v721_v47, 1  ;;  %v2377_v42 = vld [vmem:[#allocation7 + $0x18] sm:$0xff]  }
 0x26e   :  { %1988 = vmatmul.mubr.f32.vlgmr.msra.gmra.mrb[0].mxu1 %v710_v43  ;;  %v723_v49 = vadd.f32 %v722_v48, %v721_v47  ;;  %v2378_v43 = vld [vmem:[#allocation7 + $0x20] sm:$0xff]  }
 0x26f   :  { %2225 = vmatpush3.bf16.msra.mxu1 %v2805_v35  ;;  %2022 = vmatprep.mubr.msk.f32.mxu1 %vm2596_vm1, %v2597_v18  ;;  %v2382_v47 = vld [vmem:[#allocation7 + $0x80] sm:$0xff]  }
 0x270   :  { %2226 = vmatprep.subr.bf16.mxu1 %v2595_v34 }
 0x273   :  { %2228 = vmatpush3.bf16.msra.mxu1 %v2808_v37 }
 0x274   :  { %2229 = vmatprep.subr.bf16.mxu1 %v2595_v34 }
 0x277   :  { %2231 = vmatpush3.bf16.msra.mxu1 %v2812_v40 }
 0x278   :  { %2232 = vmatprep.subr.bf16.mxu1 %v2595_v34 }
 0x27b   :  { %2234 = vmatpush3.bf16.msra.mxu1 %v2824_v62 }
 0x27c   :  { %2235 = vmatprep.subr.bf16.mxu1 %v2595_v34 }
 0x27f   :  { %2237 = vmatpush3.bf16.msra.mxu1 %v2830_v1 }
 0x280   :  { %2238 = vmatprep.subr.bf16.mxu1 %v2595_v34 }
 0x283   :  { %2240 = vmatpush3.bf16.msra.mxu1 %v2836_v4 }
 0x284   :  { %2241 = vmatprep.subr.bf16.mxu1 %v2595_v34 }
 0x287   :  { %2243 = vmatpush3.bf16.msra.mxu1 %v2842_v14 }
 0x288   :  { %2244 = vmatprep.subr.bf16.mxu1 %v2595_v34 }
 0x28b   :  { %2246 = vmatpush3.bf16.msra.mxu1 %v2849_v19 }
 0x28e   :  { %2023 = vmatmul.mubr.f32.vlgmr.msra.gmra.mrb[2].mxu1 %v723_v49 }
 0x28f   :  { %2033 = vmatprep.mubr.msk.f32.mxu1 %vm158_vm0, %v2760_v5 }
 0x341   :  { %v790_v50 = vpop.f32.mrb[0].mxu1 }
 0x342   :  { %v1989_v51 = vpop.f32.mrb[1].mxu1  ;;  %v794_v52 = vmul.f32 0.001953125, %v790_v50 }
 0x344   :  { %v866_v54 = vmul.f32 %v794_v52, %v794_v52 }
 0x361   :  { %v861_v53 = vpop.f32.mrb[2].mxu1 }
 0x362   :  { %v865_v55 = vmul.f32 0.001953125, %v861_v53  ;;  %v2024_v56 = vpop.f32.mrb[3].mxu1 }
 0x364   :  { %v867_v57 = vsub.f32 %v865_v55, %v866_v54  ;;  %v2383_v54 = vld [vmem:[#allocation7 + $0x88] sm:$0xff]  }
 0x366   :  { %v868_v58 = vmax.f32 %v867_v57, 0.0  ;;  %v2384_v57 = vld [vmem:[#allocation7 + $0x90] sm:$0xff]  }
 0x368   :  { %v869_v59 = vadd.f32 1e-05, %v868_v58 }
 0x36a   :  { %2390 = vrsqrt.f32 %v869_v59 }
 0x374   :  { %v2391_v5 = vpop.eup %2390 }
 0x375   :  { %v872_v2 = vmul.f32 %v2391_v5, %v871_v63  ;;  %v2386_v5 = vld [vmem:[#allocation7 + $0xa0] sm:$0xff]  }
 0x377   :  { %v874_v6 = vmul.f32 %v872_v2, %v794_v52  ;;  %v879_v11 = vrot.slane %v872_v2, %v2900_v0  ;;  %v2387_v2 = vld [vmem:[#allocation7 + $0xa8] sm:$0xff]  }
 0x379   :  { %v875_v16 = vsub.f32 %v873_v3, %v874_v6  ;;  %v880_v17 = vmul.f32 %v879_v11, %v2860_v21  ;;  %v881_v24 = vmul.f32 %v879_v11, %v2864_v23  ;;  %v882_v25 = vmul.f32 %v2858_v20, %v879_v11  ;;  %v2366_v20 = vld [vmem:[#allocation7 + $0x40] sm:$0xff]   ;;  %v2367_v21 = vld [vmem:[#allocation7 + $0x48] sm:$0xff]   ;;  %v2376_v23 = vld [vmem:[#allocation7 + $0x10] sm:$0xff]  }
 0x37a   :  { %v883_v26 = vmul.f32 %v2862_v22, %v879_v11  ;;  %v2374_v22 = vld [vmem:[#allocation7] sm:$0xff]   ;;  %v2388_v3 = vld [vmem:[#allocation7 + $0xb0] sm:$0xff]   ;;  %v2389_v6 = vld [vmem:[#allocation7 + $0xb8] sm:$0xff]  }
 0x37b   :  { %v888_v27 = vrot.slane %v875_v16, %v2900_v0 }
 0x37d   :  { %v890_v28 = vadd.f32 %v888_v27, %v880_v17  ;;  %v891_v29 = vadd.f32 %v888_v27, %v881_v24  ;;  %v892_v30 = vadd.f32 %v888_v27, %v882_v25  ;;  %v893_v31 = vadd.f32 %v888_v27, %v883_v26 }
 0x37f   :  { %v894_v32 = vmax.f32 %v890_v28, 0.0  ;;  %v895_v33 = vmax.f32 %v891_v29, 0.0  ;;  %v896_v36 = vmax.f32 %v892_v30, 0.0  ;;  %v897_v38 = vmax.f32 %v893_v31, 0.0 }
 0x381   :  { %v898_v39 = vpack.c.bf16 %v895_v33, %v894_v32  ;;  %v899_v41 = vpack.c.bf16 %v897_v38, %v896_v36 }
 0x383   :  { %2248 = vmatprep.subr.bf16.mxu1 %v898_v39 }
 0x384   :  { %2250 = vmatpush3.bf16.msra.mxu1 %v898_v39 }
 0x385   :  { %2252 = vmatprep.subr.bf16.mxu1 %v899_v41 }
 0x388   :  { %2254 = vmatpush3.bf16.msra.mxu1 %v899_v41 }
 0x389   :  { %2256 = vmatprep.subr.bf16.mxu1 %v898_v39 }
 0x38b   :  { %2034 = vmatmul.mubr.msk.f32.vlgmr.msra.gmra.mrb[4].mxu1 %vm158_vm0, %v2764_v7  ;;  %v2368_v7 = vld [vmem:[#allocation7 + $0x50] sm:$0xff]  }
 0x38c   :  { %2258 = vmatpush3.bf16.msra.mxu1 %v898_v39  ;;  %2036 = vmatprep.mubr.msk.f32.mxu1 %vm158_vm0, %v2766_v8  ;;  %v2369_v8 = vld [vmem:[#allocation7 + $0x58] sm:$0xff]  }
 0x38d   :  { %2260 = vmatprep.subr.bf16.mxu1 %v899_v41 }
 0x38f   :  { %2037 = vmatmul.mubr.msk.f32.gmra.mrb[6].mxu1 %vm158_vm0, %v2770_v9  ;;  %v2370_v9 = vld [vmem:[#allocation7 + $0x60] sm:$0xff]  }
 0x390   :  { %2262 = vmatpush3.bf16.msra.mxu1 %v899_v41  ;;  %2047 = vmatprep.mubr.msk.f32.mxu1 %vm158_vm0, %v2777_v10  ;;  %v2371_v10 = vld [vmem:[#allocation7 + $0x68] sm:$0xff]  }
 0x391   :  { %2053 = vmatprep.subr.bf16.mxu1 %v2366_v20 }
 0x393   :  { %2048 = vmatmul.mubr.msk.f32.vlgmr.msra.gmra.mrb[8].mxu1 %vm158_vm0, %v2784_v12  ;;  %v2372_v12 = vld [vmem:[#allocation7 + $0x70] sm:$0xff]  }
 0x394   :  { %2054 = vmatpush3.bf16.msra.mxu1 %v2366_v20  ;;  %2050 = vmatprep.mubr.msk.f32.mxu1 %vm158_vm0, %v2791_v13  ;;  %v2373_v13 = vld [vmem:[#allocation7 + $0x78] sm:$0xff]  }
 0x395   :  { %2055 = vmatprep.subr.bf16.mxu1 %v2367_v21 }
 0x397   :  { %2051 = vmatmul.mubr.msk.f32.gmra.mrb[10].mxu1 %vm158_vm0, %v2796_v15  ;;  %v2375_v15 = vld [vmem:[#allocation7 + $0x8] sm:$0xff]  }
 0x398   :  { %2056 = vmatpush3.bf16.msra.mxu1 %v2367_v21  ;;  %2069 = vmatprep.mubr.bf16.mxu1 %v898_v39 }
 0x399   :  { %2057 = vmatprep.subr.bf16.mxu1 %v2368_v7 }
 0x39c   :  { %2058 = vmatpush3.bf16.msra.mxu1 %v2368_v7 }
 0x39d   :  { %2059 = vmatprep.subr.bf16.mxu1 %v2369_v8 }
 0x3a0   :  { %2060 = vmatpush3.bf16.msra.mxu1 %v2369_v8 }
 0x3a1   :  { %2061 = vmatprep.subr.bf16.mxu1 %v2370_v9 }
 0x3a4   :  { %2062 = vmatpush3.bf16.msra.mxu1 %v2370_v9 }
 0x3a5   :  { %2063 = vmatprep.subr.bf16.mxu1 %v2371_v10 }
 0x3a8   :  { %2064 = vmatpush3.bf16.msra.mxu1 %v2371_v10 }
 0x3a9   :  { %2065 = vmatprep.subr.bf16.mxu1 %v2372_v12 }
 0x3ac   :  { %2066 = vmatpush3.bf16.msra.mxu1 %v2372_v12 }
 0x3ad   :  { %2067 = vmatprep.subr.bf16.mxu1 %v2373_v13 }
 0x3b0   :  { %2068 = vmatpush3.bf16.msra.mxu1 %v2373_v13 }
 0x3b1   :  { %2073 = vmatprep.subr.bf16.mxu1 %v2374_v22 }
 0x3b3   :  { %2070 = vmatmul.mubr.bf16.vlgmr.msra.gmra.mrb[12].mxu1 %v899_v41 }
 0x3b4   :  { %2074 = vmatpush3.bf16.msra.mxu1 %v2374_v22 }
 0x3b5   :  { %2075 = vmatprep.subr.bf16.mxu1 %v2375_v15 }
 0x3b8   :  { %2076 = vmatpush3.bf16.msra.mxu1 %v2375_v15 }
 0x3b9   :  { %2077 = vmatprep.subr.bf16.mxu1 %v2376_v23 }
 0x3bc   :  { %2078 = vmatpush3.bf16.msra.mxu1 %v2376_v23 }
 0x3bd   :  { %2079 = vmatprep.subr.bf16.mxu1 %v2377_v42 }
 0x3c0   :  { %2080 = vmatpush3.bf16.msra.mxu1 %v2377_v42 }
 0x3c1   :  { %2081 = vmatprep.subr.bf16.mxu1 %v2378_v43 }
 0x3c4   :  { %2082 = vmatpush3.bf16.msra.mxu1 %v2378_v43  ;;  %v1588_v43 = vld [vmem:[#allocation8] sm:$0x1] }
 0x3c5   :  { %2083 = vmatprep.subr.bf16.mxu1 %v2379_v44 }
 0x3c8   :  { %2084 = vmatpush3.bf16.msra.mxu1 %v2379_v44 }
 0x3c9   :  { %2085 = vmatprep.subr.bf16.mxu1 %v2380_v45 }
 0x3cc   :  { %2086 = vmatpush3.bf16.msra.mxu1 %v2380_v45 }
 0x3cd   :  { %2087 = vmatprep.subr.bf16.mxu1 %v2381_v46 }
 0x3d0   :  { %2088 = vmatpush3.bf16.msra.mxu1 %v2381_v46 }
 0x3d1   :  { %2093 = vmatprep.subr.bf16.mxu1 %v2382_v47 }
 0x45e   :  { %v2035_v48 = vpop.f32.mrb[4].mxu1 }
 0x45f   :  { %v966_v49 = vpop.f32.mrb[5].mxu1 }
 0x460   :  { %v985_v50 = vpack.c.bf16 %v2035_v48, %v966_v49 }
 0x462   :  { %v2038_v51 = vpop.f32.mrb[6].mxu1  ;;  %2089 = vmatprep.mubr.bf16.mxu1 %v985_v50 }
 0x463   :  { %v976_v52 = vpop.f32.mrb[7].mxu1 }
 0x464   :  { %v986_v53 = vpack.c.bf16 %v2038_v51, %v976_v52 }
 0x466   :  { %2090 = vmatmul.mubr.bf16.vlgmr.msra.gmra.mrb[12].mxu1 %v986_v53  ;;  %v2049_v55 = vpop.f32.mrb[8].mxu1 }
 0x467   :  { %2094 = vmatpush3.bf16.msra.mxu1 %v2382_v47  ;;  %v1053_v56 = vpop.f32.mrb[9].mxu1 }
 0x468   :  { %2095 = vmatprep.subr.bf16.mxu1 %v2383_v54  ;;  %v1072_v58 = vpack.c.bf16 %v2049_v55, %v1053_v56  ;;  %v2394_v56 = vld [vmem:[#allocation2] sm:$0xff] }
 0x46a   :  { %v2052_v59 = vpop.f32.mrb[10].mxu1  ;;  %2109 = vmatprep.mubr.bf16.mxu1 %v1072_v58  ;;  %v2395_v58 = vld [vmem:[#allocation2 + $0x8] sm:$0xff] }
 0x46b   :  { %2096 = vmatpush3.bf16.msra.mxu1 %v2383_v54  ;;  %v1063_v60 = vpop.f32.mrb[11].mxu1 }
 0x46c   :  { %2097 = vmatprep.subr.bf16.mxu1 %v2384_v57  ;;  %v1073_v63 = vpack.c.bf16 %v2052_v59, %v1063_v60  ;;  %v2396_v60 = vld [vmem:[#allocation2 + $0x10] sm:$0xff] }
 0x46f   :  { %2098 = vmatpush3.bf16.msra.mxu1 %v2384_v57 }
 0x470   :  { %2099 = vmatprep.subr.bf16.mxu1 %v2385_v61 }
 0x473   :  { %2100 = vmatpush3.bf16.msra.mxu1 %v2385_v61 }
 0x474   :  { %2101 = vmatprep.subr.bf16.mxu1 %v2386_v5 }
 0x477   :  { %2102 = vmatpush3.bf16.msra.mxu1 %v2386_v5 }
 0x478   :  { %2103 = vmatprep.subr.bf16.mxu1 %v2387_v2 }
 0x47b   :  { %2104 = vmatpush3.bf16.msra.mxu1 %v2387_v2 }
 0x47c   :  { %2105 = vmatprep.subr.bf16.mxu1 %v2388_v3 }
 0x47f   :  { %2106 = vmatpush3.bf16.msra.mxu1 %v2388_v3 }
 0x480   :  { %2107 = vmatprep.subr.bf16.mxu1 %v2389_v6 }
 0x483   :  { %2108 = vmatpush3.bf16.msra.mxu1 %v2389_v6 }
 0x486   :  { %2110 = vmatmul.mubr.bf16.vlgmr.msra.gmra.mrb[12].mxu1 %v1073_v63  ;;  %v2397_v63 = vld [vmem:[#allocation2 + $0x18] sm:$0xff] }
 0x559   :  { %v2925_v11 = vpop.f32.mrb[12].mxu1 }
 0x55a   :  { %v1400_v16 = vpop.f32.mrb[13].mxu1  ;;  %v1430_v28 = vmul.f32 %v2925_v11, %v2925_v11 }
 0x55b   :  { %v2927_v17 = vpop.f32.mrb[14].mxu1  ;;  %v1428_v25 = vmul.f32 %v1400_v16, %v1400_v16 }
 0x55c   :  { %v1403_v24 = vpop.f32.mrb[15].mxu1  ;;  %v1431_v31 = vmul.f32 %v2927_v17, %v2927_v17 }
 0x55d   :  { %v1419_v26 = vadd.f32 %v1403_v24, %v1400_v16  ;;  %v1429_v27 = vmul.f32 %v1403_v24, %v1403_v24 }
 0x55f   :  { %v1420_v29 = vadd.f32 %v2925_v11, %v1419_v26  ;;  %v1432_v30 = vadd.f32 %v1429_v27, %v1428_v25 }
 0x561   :  { %v1421_v32 = vadd.f32 %v2927_v17, %v1420_v29  ;;  %v1433_v33 = vadd.f32 %v1432_v30, %v1430_v28 }
 0x563   :  { %v1422_v36 = vrot.slane %v1421_v32, 4  ;;  %v1434_v38 = vadd.f32 %v1433_v33, %v1431_v31 }
 0x565   :  { %v1423_v39 = vadd.f32 %v1422_v36, %v1421_v32  ;;  %v1435_v8 = vrot.slane %v1434_v38, 4 }
 0x567   :  { %v1424_v41 = vrot.slane %v1423_v39, 2  ;;  %v1436_v9 = vadd.f32 %v1435_v8, %v1434_v38 }
 0x569   :  { %v1425_v20 = vadd.f32 %v1424_v41, %v1423_v39 }
 0x56b   :  { %v1426_v21 = vrot.slane %v1425_v20, 1 }
 0x56d   :  { %v1427_v7 = vadd.f32 %v1426_v21, %v1425_v20 }
 0x56f   :  { %2146 = vmatmul.mubr.f32.vlgmr.msra.gmra.mrb[12].mxu0 %v1427_v7 }
 0x570   :  { %2289 = vmatpush3.bf16.msra.mxu0 %v2805_v35  ;;  %2180 = vmatprep.mubr.msk.f32.mxu0 %vm2596_vm1, %v2597_v18  ;;  %v1437_v35 = vrot.slane %v1436_v9, 2 }
 0x571   :  { %2290 = vmatprep.subr.bf16.mxu0 %v2595_v34 }
 0x574   :  { %2292 = vmatpush3.bf16.msra.mxu0 %v2808_v37  ;;  %v1438_v37 = vadd.f32 %v1437_v35, %v1436_v9 }
 0x575   :  { %2293 = vmatprep.subr.bf16.mxu0 %v2595_v34 }
 0x578   :  { %2295 = vmatpush3.bf16.msra.mxu0 %v2812_v40  ;;  %v1439_v40 = vrot.slane %v1438_v37, 1 }
 0x579   :  { %2296 = vmatprep.subr.bf16.mxu0 %v2595_v34 }
 0x57c   :  { %2298 = vmatpush3.bf16.msra.mxu0 %v2824_v62  ;;  %v1440_v62 = vadd.f32 %v1439_v40, %v1438_v37 }
 0x57d   :  { %2299 = vmatprep.subr.bf16.mxu0 %v2595_v34 }
 0x580   :  { %2301 = vmatpush3.bf16.msra.mxu0 %v2830_v1 }
 0x581   :  { %2302 = vmatprep.subr.bf16.mxu0 %v2595_v34 }
 0x584   :  { %2304 = vmatpush3.bf16.msra.mxu0 %v2836_v4 }
 0x585   :  { %2305 = vmatprep.subr.bf16.mxu0 %v2595_v34 }
 0x588   :  { %2307 = vmatpush3.bf16.msra.mxu0 %v2842_v14 }
 0x589   :  { %2308 = vmatprep.subr.bf16.mxu0 %v2595_v34  ;;  %v1590_v34 = vld [vmem:[#allocation10] sm:$0x1] }
 0x58c   :  { %2310 = vmatpush3.bf16.msra.mxu0 %v2849_v19 }
 0x58f   :  { %2181 = vmatmul.mubr.f32.vlgmr.msra.gmra.mrb[14].mxu0 %v1440_v62 }
 0x642   :  { %v1507_v18 = vpop.f32.mrb[12].mxu0 }
 0x643   :  { %v2147_v10 = vpop.f32.mrb[13].mxu0  ;;  %v1511_v1 = vmul.f32 0.001953125, %v1507_v18 }
 0x645   :  { %v1583_v13 = vmul.f32 %v1511_v1, %v1511_v1 }
 0x662   :  { %v1578_v12 = vpop.f32.mrb[14].mxu0 }
 0x663   :  { %v1582_v22 = vmul.f32 0.001953125, %v1578_v12  ;;  %v2182_v15 = vpop.f32.mrb[15].mxu0 }
 0x665   :  { %v1584_v4 = vsub.f32 %v1582_v22, %v1583_v13 }
 0x667   :  { %v1585_v23 = vmax.f32 %v1584_v4, 0.0 }
 0x669   :  { %v1586_v42 = vadd.f32 1e-05, %v1585_v23 }
 0x66b   :  { %2392 = vrsqrt.f32 %v1586_v42 }
 0x675   :  { %v2393_v14 = vpop.eup %2392 }
 0x676   :  { %v1589_v44 = vmul.f32 %v2393_v14, %v1588_v43 }
 0x678   :  { %v1591_v45 = vmul.f32 %v1589_v44, %v1511_v1  ;;  %v1596_v19 = vrot.slane %v1589_v44, %v2900_v0 }
 0x67a   :  { %v1592_v46 = vsub.f32 %v1590_v34, %v1591_v45  ;;  %v1597_v47 = vmul.f32 %v1596_v19, %v1400_v16  ;;  %v1598_v48 = vmul.f32 %v1596_v19, %v1403_v24  ;;  %v1599_v49 = vmul.f32 %v2925_v11, %v1596_v19 }
 0x67b   :  { %v1600_v50 = vmul.f32 %v2927_v17, %v1596_v19 }
 0x67c   :  { %v1605_v51 = vrot.slane %v1592_v46, %v2900_v0 }
 0x67e   :  { %v1607_v52 = vadd.f32 %v1605_v51, %v1597_v47  ;;  %v1608_v53 = vadd.f32 %v1605_v51, %v1598_v48  ;;  %v1609_v54 = vadd.f32 %v1605_v51, %v1599_v49  ;;  %v1610_v55 = vadd.f32 %v1605_v51, %v1600_v50 }
 0x680   :  { %v1611_v57 = vadd.f32 %v2394_v56, %v1607_v52  ;;  %v1612_v59 = vadd.f32 %v2395_v58, %v1608_v53  ;;  %v1613_v61 = vadd.f32 %v2396_v60, %v1609_v54  ;;  %v1614_v5 = vadd.f32 %v2397_v63, %v1610_v55 }
 0x682   :  { %v1615_v2 = vmax.f32 %v1611_v57, 0.0  ;;  %v1616_v3 = vmax.f32 %v1612_v59, 0.0  ;;  %v1617_v6 = vmax.f32 %v1613_v61, 0.0  ;;  %v1618_v11 = vmax.f32 %v1614_v5, 0.0 }
 0x684   :  { %1619 = vst [vmem:[#allocation14] sm:$0xff] %v1615_v2  ;;  %1620 = vst [vmem:[#allocation14 + $0x8] sm:$0xff] %v1616_v3 }
 0x685   :  { %1621 = vst [vmem:[#allocation14 + $0x10] sm:$0xff] %v1617_v6  ;;  %1622 = vst [vmem:[#allocation14 + $0x18] sm:$0xff] %v1618_v11 }
 0x686   :  { %2563 = shalt.err (!%p2560_p4)
}
 0x687   :  { %s2564_s29 = scalar_lea.hbm %s2981_s10, 512 }
 0x688   :  { %p2565_p5 = scmp.ne.s32.totalorder %s2981_s10, %s2564_s29  ;;  %p2568_p6 = scmp.lt.u32.totalorder %s2564_s29, %s2981_s10 }
 0x68a   :  { %p2570_p7 = pnand %p2568_p6, %p2565_p5 }
 0x68c   :  { %2573 = shalt.err (!%p2570_p7)
}
 0x68d   :  { %1634 = dma.vmem_to_hbm [thread:$0]  %s1629_s3, 512, %s2981_s10, [#allocation4], %s2590_s28, %s2590_s28, %s2591_s13  }
 0x68e   :  { %2582 = dma.done.wait [#allocation4], 512  }
 0x68f   :  { %2583 = vsyncadd [#allocation4], 4294966784 }
 0x690   :  { %1638 = vsyncpa [#allocation3], 1 }
 0x691   :  { %1639 = vsyncpa [#allocation6], 1 }
 0x692   :  { %1640 = vsyncpa [#allocation9], 1 }
 0x693   :  { %1641 = vsyncpa [#allocation12], 1 }
 0x694   :  { %1642 = vsyncpa [#allocation4], 1 }

</bundles_post_ra>
